<compile_context>
chip_gen: v5e
topology: v5e:2x2
jax: 0.10.0
libtpu: 0.0.40
codegen_flags: <defaults>
</compile_context>

<pallas_src>
import functools

import jax
import jax.numpy as jnp
from jax.experimental import pallas as pl
from jax.experimental.pallas import tpu as pltpu

LANES = 128


def _device_kind():
    try:
        return jax.devices()[0].device_kind.lower()
    except Exception:
        return ""


def _tensorcores_per_chip():
    # v7x exposes 2 TensorCores behind one device; v5e/v6e have 1 (a core split there
    # is just an extra serial grid step). Falling back to 1 is always correct.
    return 2 if "v7" in _device_kind() else 1


def _has_bf16_vpu():
    # v6e/v7x have bf16 VALUs; v5e does not -> keep the f32-upcast compute path there.
    kind = _device_kind()
    return ("v6" in kind) or ("v7" in kind)


def _masked_mae_kernel(p_ref, g_ref, sum_ref, cnt_ref, acc_sum, acc_cnt, *,
                       total_rows, block_rows, native_compute):
    c = pl.program_id(0)            # core-split axis ("parallel": shards across v7x TCs)
    j = pl.program_id(1)            # reduction axis ("arbitrary")
    nj = pl.num_programs(1)
    folds = block_rows // 8

    @pl.when(j == 0)
    def _():
        acc_sum[...] = jnp.zeros_like(acc_sum)
        acc_cnt[...] = jnp.zeros_like(acc_cnt)

    blk = c * nj + j
    row0 = blk * block_rows

    def accumulate(extra_mask=None):
        if native_compute:
            # bf16-native sub/abs/compare (packed 16x128 vregs); f32 only at accumulate.
            p = p_ref[...]
            g = g_ref[...]
        else:
            p = p_ref[...].astype(jnp.float32)
            g = g_ref[...].astype(jnp.float32)
        valid = g >= 0
        if extra_mask is not None:
            valid = jnp.logical_and(valid, extra_mask)
        diff = jnp.abs(p - g)
        # jnp.where (not multiply) so garbage rows of a ragged tail block (possibly
        # NaN/Inf) can never poison the accumulator.
        masked = jnp.where(valid, diff, jnp.zeros_like(diff)).astype(jnp.float32)
        cnt = valid.astype(jnp.float32)
        # Layout-free fold: last two dims stay the native (8,128) tile, so the reshape
        # is free and the axis-0 sum is pure VALU adds into one-vreg accumulators.
        acc_sum[...] += masked.reshape(folds, 8, LANES).sum(axis=0)
        acc_cnt[...] += cnt.reshape(folds, 8, LANES).sum(axis=0)

    is_tail = row0 + block_rows > total_rows

    @pl.when(jnp.logical_not(is_tail))
    def _():
        accumulate()                 # fast path: interior block, mask is just g >= 0

    @pl.when(is_tail)
    def _():
        # Only the single ragged tail block pays for the iota row-bounds mask.
        row_ids = row0 + jax.lax.broadcasted_iota(jnp.int32, (block_rows, LANES), 0)
        accumulate(row_ids < total_rows)

    @pl.when(j == nj - 1)
    def _():
        # One cross-lane reduce of a single vreg each, straight into the SMEM outputs.
        sum_ref[0, 0] = jnp.sum(acc_sum[...])
        cnt_ref[0, 0] = jnp.sum(acc_cnt[...])


def masked_mae(preds, gts, *, block_rows=2048):
    # Mirror PyTorch: squeeze channel dim of preds if shapes differ.
    if preds.shape != gts.shape:
        preds = jnp.squeeze(preds, axis=1)
    assert preds.shape == gts.shape
    assert block_rows > 0 and block_rows % 16 == 0

    # Keep native dtype (no host-side f32 cast); kernel upcasts per tile if needed.
    p_flat = preds.reshape(-1)
    g_flat = gts.reshape(-1)
    n = p_flat.shape[0]

    n_main = (n // LANES) * LANES
    rem = n - n_main

    # <128-element remainder: tiny plain-jnp reduction outside the kernel -- no
    # full-array host-side pad copy.
    tail_sum = jnp.float32(0.0)
    tail_cnt = jnp.float32(0.0)
    if rem:
        pt = p_flat[n_main:].astype(jnp.float32)
        gt = g_flat[n_main:].astype(jnp.float32)
        vm = gt >= 0.0
        tail_sum = jnp.sum(jnp.where(vm, jnp.abs(pt - gt), 0.0))
        tail_cnt = jnp.sum(vm.astype(jnp.float32))

    if n_main == 0:
        # NaN when nothing is valid -- matches torch L1Loss over an empty selection.
        return (tail_sum / tail_cnt).astype(jnp.float32)

    rows = n_main // LANES
    p2 = p_flat[:n_main].reshape(rows, LANES)   # free reshape when rem == 0
    g2 = g_flat[:n_main].reshape(rows, LANES)

    # Block rows: multiple of 16 (bf16 native tile), at most block_rows; a block taller
    # than the array is just a ragged block handled by the gated tail path.
    block_rows_eff = min(block_rows, ((rows + 15) // 16) * 16)
    num_blocks = pl.cdiv(rows, block_rows_eff)

    # Core split only where it pays off (v7x, 2 TCs) and only when exact, so no clamped
    # duplicate block ever gets DMA'd.
    num_cores = 2 if (_tensorcores_per_chip() >= 2 and num_blocks >= 2
                      and num_blocks % 2 == 0) else 1
    blocks_per_core = num_blocks // num_cores

    def in_index_map(c, j):
        return (c * blocks_per_core + j, 0)

    native_compute = (p2.dtype == jnp.bfloat16 and g2.dtype == jnp.bfloat16
                      and _has_bf16_vpu())

    kernel = functools.partial(
        _masked_mae_kernel, total_rows=rows, block_rows=block_rows_eff,
        native_compute=native_compute)

    # Note: if an xprof trace on v5e shows exposed DMA at step boundaries, add
    # pipeline_mode=pl.Buffered(3) to the two input BlockSpecs (cheap now that the
    # accumulators are one vreg each).
    sum_out, cnt_out = pl.pallas_call(
        kernel,
        out_shape=(
            jax.ShapeDtypeStruct((num_cores, 1), jnp.float32),
            jax.ShapeDtypeStruct((num_cores, 1), jnp.float32),
        ),
        grid_spec=pltpu.PrefetchScalarGridSpec(
            num_scalar_prefetch=0,
            grid=(num_cores, blocks_per_core),
            in_specs=[
                pl.BlockSpec((block_rows_eff, LANES), in_index_map),
                pl.BlockSpec((block_rows_eff, LANES), in_index_map),
            ],
            out_specs=(
                pl.BlockSpec((1, 1), lambda c, j: (c, 0), memory_space=pltpu.SMEM),
                pl.BlockSpec((1, 1), lambda c, j: (c, 0), memory_space=pltpu.SMEM),
            ),
            scratch_shapes=[
                pltpu.VMEM((8, LANES), jnp.float32),   # one-vreg sum accumulator
                pltpu.VMEM((8, LANES), jnp.float32),   # one-vreg count accumulator
            ],
        ),
        compiler_params=pltpu.CompilerParams(
            dimension_semantics=("parallel", "arbitrary"),
        ),
    )(p2, g2)

    total_sum = jnp.sum(sum_out) + tail_sum
    total_cnt = jnp.sum(cnt_out) + tail_cnt
    # NaN when no element is valid -- matches torch L1Loss over an empty selection.
    return (total_sum / total_cnt).astype(jnp.float32)


def _ref_masked_mae(preds, gts):
    if preds.shape != gts.shape:
        preds = jnp.squeeze(preds, axis=1)
    p = preds.astype(jnp.float32)
    g = gts.astype(jnp.float32)
    mask = (g >= 0.0).astype(jnp.float32)
    return jnp.sum(jnp.abs(p - g) * mask) / jnp.sum(mask)


if __name__ == "__main__":
    key = jax.random.PRNGKey(0)

    # Case 1: (B,1,H,W) preds vs (B,H,W) gts -> squeeze(1); n % 128 == 0, rows=4 < 16
    # (single ragged block -> exercises the gated tail path).
    k1, k2, key = jax.random.split(key, 3)
    preds1 = jax.random.normal(k1, (2, 1, 16, 16), dtype=jnp.float32)
    gts1 = jax.random.normal(k2, (2, 16, 16), dtype=jnp.float32)  # ~half masked out
    out1 = jax.block_until_ready(masked_mae(preds1, gts1))
    assert jnp.allclose(out1, _ref_masked_mae(preds1, gts1), rtol=1e-5, atol=1e-6)

    # Case 2: ragged element count (n % 128 != 0) -> kernel main part + jnp tail slice.
    k1, k2, key = jax.random.split(key, 3)
    preds2 = jax.random.normal(k1, (3, 7, 11), dtype=jnp.float32)
    gts2 = jax.random.normal(k2, (3, 7, 11), dtype=jnp.float32)
    out2 = jax.block_until_ready(masked_mae(preds2, gts2))
    assert jnp.allclose(out2, _ref_masked_mae(preds2, gts2), rtol=1e-5, atol=1e-6)

    # Case 3: bf16 multi-block with a ragged tail block (small block_rows override);
    # tolerance accounts for the bf16-native diff path on v6e/v7x.
    k1, k2, key = jax.random.split(key, 3)
    preds3 = jax.random.normal(k1, (2, 36, 128), dtype=jnp.bfloat16)
    gts3 = jax.random.normal(k2, (2, 36, 128), dtype=jnp.bfloat16)
    out3 = jax.block_until_ready(masked_mae(preds3, gts3, block_rows=16))
    assert jnp.allclose(out3, _ref_masked_mae(preds3, gts3), rtol=2e-3, atol=1e-3)

    # Case 4: f32 multi-block, interior-only fast path, even block count (exact v7x split).
    k1, k2, key = jax.random.split(key, 3)
    preds4 = jax.random.normal(k1, (4, 64, 128), dtype=jnp.float32)
    gts4 = jax.random.normal(k2, (4, 64, 128), dtype=jnp.float32)
    out4 = jax.block_until_ready(masked_mae(preds4, gts4, block_rows=64))
    assert jnp.allclose(out4, _ref_masked_mae(preds4, gts4), rtol=1e-5, atol=1e-6)

    print("KERNEL_OK")
</pallas_src>

<mosaic_0001>
module attributes {stable_mosaic.version = 11 : i64} {
  func.func @_masked_mae_kernel(%arg0: i32, %arg1: i32, %arg2: memref<16x128xf32, #tpu.memory_space<vmem>>, %arg3: memref<16x128xf32, #tpu.memory_space<vmem>>, %arg4: memref<1x1xf32, #tpu.memory_space<smem>>, %arg5: memref<1x1xf32, #tpu.memory_space<smem>>, %arg6: memref<8x128xf32, #tpu.memory_space<vmem>>, %arg7: memref<8x128xf32, #tpu.memory_space<vmem>>) attributes {dimension_semantics = [#tpu.dimension_semantics<parallel>, #tpu.dimension_semantics<arbitrary>], iteration_bounds = array<i64: 1, 1>, scalar_prefetch = 0 : i64, scratch_operands = 2 : i64, tpu.core_type = #tpu.core_type<tc>, window_params = [{transform_indices = @transform_0, window_bounds = array<i64: 16, 128>}, {transform_indices = @transform_1, window_bounds = array<i64: 16, 128>}, {transform_indices = @transform_2, window_bounds = array<i64: 1, 1>}, {transform_indices = @transform_3, window_bounds = array<i64: 1, 1>}]} {
    %c0_i32 = arith.constant 0 : i32
    %0 = arith.cmpi eq, %arg1, %c0_i32 : i32
    %1 = arith.extui %0 : i1 to i32
    %c0_i32_0 = arith.constant 0 : i32
    %2 = arith.cmpi ne, %1, %c0_i32_0 : i32
    scf.if %2 {
      %cst = arith.constant 0.000000e+00 : f32
      %16 = vector.broadcast %cst : f32 to vector<8x128xf32>
      %c0 = arith.constant 0 : index
      %c0_6 = arith.constant 0 : index
      %17 = vector.load %arg6[%c0, %c0_6] : memref<8x128xf32, #tpu.memory_space<vmem>>, vector<8x128xf32>
      tpu.vector_store %arg6[%c0, %c0_6], %16 {strides = array<i32>} : memref<8x128xf32, #tpu.memory_space<vmem>>, vector<8x128xf32>,
      %cst_7 = arith.constant 0.000000e+00 : f32
      %18 = vector.broadcast %cst_7 : f32 to vector<8x128xf32>
      %c0_8 = arith.constant 0 : index
      %c0_9 = arith.constant 0 : index
      %19 = vector.load %arg7[%c0_8, %c0_9] : memref<8x128xf32, #tpu.memory_space<vmem>>, vector<8x128xf32>
      tpu.vector_store %arg7[%c0_8, %c0_9], %18 {strides = array<i32>} : memref<8x128xf32, #tpu.memory_space<vmem>>, vector<8x128xf32>,
    } else {
    }
    %c1_i32 = arith.constant 1 : i32
    %3 = arith.muli %arg0, %c1_i32 : i32
    %4 = arith.addi %3, %arg1 : i32
    %c16_i32 = arith.constant 16 : i32
    %5 = arith.muli %4, %c16_i32 : i32
    %c16_i32_1 = arith.constant 16 : i32
    %6 = arith.addi %5, %c16_i32_1 : i32
    %c4_i32 = arith.constant 4 : i32
    %7 = arith.cmpi sgt, %6, %c4_i32 : i32
    %true = arith.constant true
    %8 = arith.xori %7, %true : i1
    %9 = arith.extui %8 : i1 to i32
    %c0_i32_2 = arith.constant 0 : i32
    %10 = arith.cmpi ne, %9, %c0_i32_2 : i32
    scf.if %10 {
      %c0 = arith.constant 0 : index
      %c0_6 = arith.constant 0 : index
      %16 = vector.load %arg2[%c0, %c0_6] : memref<16x128xf32, #tpu.memory_space<vmem>>, vector<16x128xf32>
      %c0_7 = arith.constant 0 : index
      %c0_8 = arith.constant 0 : index
      %17 = vector.load %arg3[%c0_7, %c0_8] : memref<16x128xf32, #tpu.memory_space<vmem>>, vector<16x128xf32>
      %cst = arith.constant 0.000000e+00 : f32
      %18 = vector.broadcast %cst : f32 to vector<16x128xf32>
      %19 = arith.cmpf oge, %17, %18 : vector<16x128xf32>
      %20 = arith.subf %16, %17 : vector<16x128xf32>
      %21 = math.absf %20 : vector<16x128xf32>
      %cst_9 = arith.constant 0.000000e+00 : f32
      %22 = vector.broadcast %cst_9 : f32 to vector<16x128xf32>
      %23 = arith.select %19, %21, %22 : vector<16x128xi1>, vector<16x128xf32>
      %24 = arith.extui %19 : vector<16x128xi1> to vector<16x128xi32>
      %25 = arith.sitofp %24 : vector<16x128xi32> to vector<16x128xf32>
      %c0_10 = arith.constant 0 : index
      %c0_11 = arith.constant 0 : index
      %26 = vector.load %arg6[%c0_10, %c0_11] : memref<8x128xf32, #tpu.memory_space<vmem>>, vector<8x128xf32>
      %27 = vector.shape_cast %23 : vector<16x128xf32> to vector<2x8x128xf32>
      %cst_12 = arith.constant dense<0.000000e+00> : vector<8x128xf32>
      %28 = vector.multi_reduction <add>, %27, %cst_12 [0] : vector<2x8x128xf32> to vector<8x128xf32>
      %29 = arith.addf %26, %28 : vector<8x128xf32>
      %c0_13 = arith.constant 0 : index
      %c0_14 = arith.constant 0 : index
      %30 = vector.load %arg6[%c0_13, %c0_14] : memref<8x128xf32, #tpu.memory_space<vmem>>, vector<8x128xf32>
      tpu.vector_store %arg6[%c0_13, %c0_14], %29 {strides = array<i32>} : memref<8x128xf32, #tpu.memory_space<vmem>>, vector<8x128xf32>,
      %c0_15 = arith.constant 0 : index
      %c0_16 = arith.constant 0 : index
      %31 = vector.load %arg7[%c0_15, %c0_16] : memref<8x128xf32, #tpu.memory_space<vmem>>, vector<8x128xf32>
      %32 = vector.shape_cast %25 : vector<16x128xf32> to vector<2x8x128xf32>
      %cst_17 = arith.constant dense<0.000000e+00> : vector<8x128xf32>
      %33 = vector.multi_reduction <add>, %32, %cst_17 [0] : vector<2x8x128xf32> to vector<8x128xf32>
      %34 = arith.addf %31, %33 : vector<8x128xf32>
      %c0_18 = arith.constant 0 : index
      %c0_19 = arith.constant 0 : index
      %35 = vector.load %arg7[%c0_18, %c0_19] : memref<8x128xf32, #tpu.memory_space<vmem>>, vector<8x128xf32>
      tpu.vector_store %arg7[%c0_18, %c0_19], %34 {strides = array<i32>} : memref<8x128xf32, #tpu.memory_space<vmem>>, vector<8x128xf32>,
    } else {
    }
    %11 = arith.extui %7 : i1 to i32
    %c0_i32_3 = arith.constant 0 : i32
    %12 = arith.cmpi ne, %11, %c0_i32_3 : i32
    scf.if %12 {
      %16 = tpu.iota {dimensions = array<i32: 0>} : vector<16x128xi32>
      %17 = vector.broadcast %5 : i32 to vector<16x128xi32>
      %18 = arith.addi %17, %16 : vector<16x128xi32>
      %c4_i32_6 = arith.constant 4 : i32
      %19 = vector.broadcast %c4_i32_6 : i32 to vector<16x128xi32>
      %20 = arith.cmpi slt, %18, %19 : vector<16x128xi32>
      %c0 = arith.constant 0 : index
      %c0_7 = arith.constant 0 : index
      %21 = vector.load %arg2[%c0, %c0_7] : memref<16x128xf32, #tpu.memory_space<vmem>>, vector<16x128xf32>
      %c0_8 = arith.constant 0 : index
      %c0_9 = arith.constant 0 : index
      %22 = vector.load %arg3[%c0_8, %c0_9] : memref<16x128xf32, #tpu.memory_space<vmem>>, vector<16x128xf32>
      %cst = arith.constant 0.000000e+00 : f32
      %23 = vector.broadcast %cst : f32 to vector<16x128xf32>
      %24 = arith.cmpf oge, %22, %23 : vector<16x128xf32>
      %25 = arith.andi %24, %20 : vector<16x128xi1>
      %26 = arith.subf %21, %22 : vector<16x128xf32>
      %27 = math.absf %26 : vector<16x128xf32>
      %cst_10 = arith.constant 0.000000e+00 : f32
      %28 = vector.broadcast %cst_10 : f32 to vector<16x128xf32>
      %29 = arith.select %25, %27, %28 : vector<16x128xi1>, vector<16x128xf32>
      %30 = arith.extui %25 : vector<16x128xi1> to vector<16x128xi32>
      %31 = arith.sitofp %30 : vector<16x128xi32> to vector<16x128xf32>
      %c0_11 = arith.constant 0 : index
      %c0_12 = arith.constant 0 : index
      %32 = vector.load %arg6[%c0_11, %c0_12] : memref<8x128xf32, #tpu.memory_space<vmem>>, vector<8x128xf32>
      %33 = vector.shape_cast %29 : vector<16x128xf32> to vector<2x8x128xf32>
      %cst_13 = arith.constant dense<0.000000e+00> : vector<8x128xf32>
      %34 = vector.multi_reduction <add>, %33, %cst_13 [0] : vector<2x8x128xf32> to vector<8x128xf32>
      %35 = arith.addf %32, %34 : vector<8x128xf32>
      %c0_14 = arith.constant 0 : index
      %c0_15 = arith.constant 0 : index
      %36 = vector.load %arg6[%c0_14, %c0_15] : memref<8x128xf32, #tpu.memory_space<vmem>>, vector<8x128xf32>
      tpu.vector_store %arg6[%c0_14, %c0_15], %35 {strides = array<i32>} : memref<8x128xf32, #tpu.memory_space<vmem>>, vector<8x128xf32>,
      %c0_16 = arith.constant 0 : index
      %c0_17 = arith.constant 0 : index
      %37 = vector.load %arg7[%c0_16, %c0_17] : memref<8x128xf32, #tpu.memory_space<vmem>>, vector<8x128xf32>
      %38 = vector.shape_cast %31 : vector<16x128xf32> to vector<2x8x128xf32>
      %cst_18 = arith.constant dense<0.000000e+00> : vector<8x128xf32>
      %39 = vector.multi_reduction <add>, %38, %cst_18 [0] : vector<2x8x128xf32> to vector<8x128xf32>
      %40 = arith.addf %37, %39 : vector<8x128xf32>
      %c0_19 = arith.constant 0 : index
      %c0_20 = arith.constant 0 : index
      %41 = vector.load %arg7[%c0_19, %c0_20] : memref<8x128xf32, #tpu.memory_space<vmem>>, vector<8x128xf32>
      tpu.vector_store %arg7[%c0_19, %c0_20], %40 {strides = array<i32>} : memref<8x128xf32, #tpu.memory_space<vmem>>, vector<8x128xf32>,
    } else {
    }
    %c0_i32_4 = arith.constant 0 : i32
    %13 = arith.cmpi eq, %arg1, %c0_i32_4 : i32
    %14 = arith.extui %13 : i1 to i32
    %c0_i32_5 = arith.constant 0 : i32
    %15 = arith.cmpi ne, %14, %c0_i32_5 : i32
    scf.if %15 {
      %c0 = arith.constant 0 : index
      %c0_6 = arith.constant 0 : index
      %16 = vector.load %arg6[%c0, %c0_6] : memref<8x128xf32, #tpu.memory_space<vmem>>, vector<8x128xf32>
      %17 = vector.shape_cast %16 : vector<8x128xf32> to vector<1x8x128xf32>
      %cst = arith.constant dense<0.000000e+00> : vector<1xf32>
      %18 = vector.multi_reduction <add>, %17, %cst [1, 2] : vector<1x8x128xf32> to vector<1xf32>
      %19 = vector.shape_cast %18 : vector<1xf32> to vector<1x1x1xf32>
      %20 = vector.extract %19[0, 0, 0] : f32 from vector<1x1x1xf32>
      %c0_7 = arith.constant 0 : index
      %c0_8 = arith.constant 0 : index
      %21 = memref.load %arg4[%c0_7, %c0_8] : memref<1x1xf32, #tpu.memory_space<smem>>
      memref.store %20, %arg4[%c0_7, %c0_8] : memref<1x1xf32, #tpu.memory_space<smem>>
      %c0_9 = arith.constant 0 : index
      %c0_10 = arith.constant 0 : index
      %22 = vector.load %arg7[%c0_9, %c0_10] : memref<8x128xf32, #tpu.memory_space<vmem>>, vector<8x128xf32>
      %23 = vector.shape_cast %22 : vector<8x128xf32> to vector<1x8x128xf32>
      %cst_11 = arith.constant dense<0.000000e+00> : vector<1xf32>
      %24 = vector.multi_reduction <add>, %23, %cst_11 [1, 2] : vector<1x8x128xf32> to vector<1xf32>
      %25 = vector.shape_cast %24 : vector<1xf32> to vector<1x1x1xf32>
      %26 = vector.extract %25[0, 0, 0] : f32 from vector<1x1x1xf32>
      %c0_12 = arith.constant 0 : index
      %c0_13 = arith.constant 0 : index
      %27 = memref.load %arg5[%c0_12, %c0_13] : memref<1x1xf32, #tpu.memory_space<smem>>
      memref.store %26, %arg5[%c0_12, %c0_13] : memref<1x1xf32, #tpu.memory_space<smem>>
    } else {
    }
    return
  }
  func.func @transform_0(%arg0: i32, %arg1: i32) -> (i32, i32) {
    %c1_i32 = arith.constant 1 : i32
    %0 = arith.muli %arg0, %c1_i32 : i32
    %1 = arith.addi %0, %arg1 : i32
    %c0_i32 = arith.constant 0 : i32
    %c0_i32_0 = arith.constant 0 : i32
    return %1, %c0_i32 : i32, i32
  }
  func.func @transform_1(%arg0: i32, %arg1: i32) -> (i32, i32) {
    %c1_i32 = arith.constant 1 : i32
    %0 = arith.muli %arg0, %c1_i32 : i32
    %1 = arith.addi %0, %arg1 : i32
    %c0_i32 = arith.constant 0 : i32
    %c0_i32_0 = arith.constant 0 : i32
    return %1, %c0_i32 : i32, i32
  }
  func.func @transform_2(%arg0: i32, %arg1: i32) -> (i32, i32) {
    %c0_i32 = arith.constant 0 : i32
    %c0_i32_0 = arith.constant 0 : i32
    return %arg0, %c0_i32 : i32, i32
  }
  func.func @transform_3(%arg0: i32, %arg1: i32) -> (i32, i32) {
    %c0_i32 = arith.constant 0 : i32
    %c0_i32_0 = arith.constant 0 : i32
    return %arg0, %c0_i32 : i32, i32
  }
}

</mosaic_0001>

<bundles_post_ra>
// kernel: tpu_custom_call.1
= control target key start
LH: loop header
LB: loop body
LE: loop exit
PB: predicated region body
PF: predicated region fallthrough
CT: control target
= control target key end

     0   :  { %9 = vsyncpa [#allocation5], 0  ;;  %s339_s0 = inlined_call_operand.hbm [shape: f32[4,128], index: 0, kind: input, shape index: {}]   ;;  %s340_s1 = inlined_call_operand.hbm [shape: f32[4,128], index: 1, kind: input, shape index: {}]   ;;  %s341_s2 = inlined_call_operand.hbm [shape: f32[1,1], index: 2, kind: output, shape index: {0}]   ;;  %s342_s3 = inlined_call_operand.hbm [shape: f32[1,1], index: 3, kind: output, shape index: {1}]  }
   0x1   :  { %10 = vsyncpa [#allocation8], 0 }
   0x2   :  { %11 = vsyncpa [#allocation6], 0 }
   0x3   :  { %12 = vsyncpa [#allocation11], 0 }
   0x4   :  { %21 = vsyncadd [#allocation5], 192  ;;  %s26_s14 = sshll.u32 %s339_s0, 4  ;;  %s300_s15 = smov [#allocation4]   ;;  %s27_s14 = int_to_ptr.hbm [resolvable:$true] %s26_s14 }
   0x5   :  { %s28_s16 = sshll.u32 %s300_s15, 4  ;;  %s301_s17 = smov 64   ;;  %s29_s16 = int_to_ptr.vmem [resolvable:$true] %s28_s16 }
   0x6   :  { %s302_s18 = smov 4  }
   0x7   :  { %34 = dma.hbm_to_vmem [thread:$0]  %s27_s14, 64, %s29_s16, [#allocation5], %s301_s17, %s301_s17, %s302_s18  }
   0x8   :  { %43 = vsyncadd [#allocation8], 192  ;;  %s48_s21 = sshll.u32 %s340_s1, 4  ;;  %s303_s22 = smov [#allocation7]   ;;  %s49_s21 = int_to_ptr.hbm [resolvable:$true] %s48_s21 }
   0x9   :  { %s50_s23 = sshll.u32 %s303_s22, 4  ;;  %s51_s23 = int_to_ptr.vmem [resolvable:$true] %s50_s23 }
   0xa   :  { %56 = dma.hbm_to_vmem [thread:$0]  %s49_s21, 64, %s51_s23, [#allocation8], %s301_s17, %s301_s17, %s302_s18  }
   0xb   :  { %292 = dma.done.wait [#allocation5], 256  }
   0xc   :  { %293 = vsyncadd [#allocation5], 4294967040 }
   0xd   :  { %294 = dma.done.wait [#allocation8], 256  }
   0xe   :  { %295 = vsyncadd [#allocation8], 4294967040  ;;  %v114_v0 = vlaneseq  ;;  %v122_v2 = vld [vmem:[#allocation4] sm:$0xff]  ;;  %v124_v3 = vld [vmem:[#allocation7] sm:$0xff]  ;;  %v304_v7 = vmov 0.0   ;;  %s180_s24 = sshll.u32 %s341_s2, 4  ;;  %s181_s24 = int_to_ptr.hbm [resolvable:$true] %s180_s24 }
   0xf   :  { %vm126_vm1 = vcmp.ge.f32.partialorder %v124_v3, 0.0  ;;  %v130_v4 = vsub.f32 %v122_v2, %v124_v3  ;;  %s305_s26 = smov [#allocation9]   ;;  %s189_s29 = sshll.u32 %s342_s3, 4  ;;  %s190_s29 = int_to_ptr.hbm [resolvable:$true] %s189_s29 }
  0x10   :  { %v115_v1 = vshrl.u32 %v114_v0, 7  ;;  %s306_s4 = smov [#allocation10]  }
  0x11   :  { %v132_v5 = vand.u32 2147483647, %v130_v4 }
  0x12   :  { %vm120_vm0 = vcmp.lt.s32.totalorder %v115_v1, 4 }
  0x13   :  { %vm128_vm2 = vmand %vm126_vm1, %vm120_vm0 }
  0x14   :  { %v134_v6 = vsel %vm128_vm2, %v132_v5, 0.0  ;;  %v208_v8 = vsel %vm128_vm2, 1.0, %v304_v7 }
  0x15   :  { %152 = vadd.xlane.f32.xlu0 %v134_v6 }
  0x1d   :  { %164 = vadd.xlane.f32.xlu0 %v208_v8 }
  0x88   :  { %v153_v9 = vpop.xlane.xlu0 %152 }
  0x89   :  { %v154_v10 = vrot.slane %v153_v9, 4 }
  0x8b   :  { %v155_v11 = vadd.f32 %v154_v10, %v153_v9 }
  0x8d   :  { %v156_v12 = vrot.slane %v155_v11, 2 }
  0x8f   :  { %v157_v13 = vadd.f32 %v156_v12, %v155_v11 }
  0x90   :  { %v165_v14 = vpop.xlane.xlu0 %164 }
  0x91   :  { %v166_v15 = vrot.slane %v165_v14, 4  ;;  %v158_v16 = vrot.slane %v157_v13, 1 }
  0x93   :  { %v167_v17 = vadd.f32 %v166_v15, %v165_v14  ;;  %v159_v18 = vadd.f32 %v158_v16, %v157_v13 }
  0x95   :  { %v168_v19 = vrot.slane %v167_v17, 2  ;;  %209 = vpush %v159_v18 }
  0x97   :  { %v169_v20 = vadd.f32 %v168_v19, %v167_v17 }
  0x99   :  { %v170_v21 = vrot.slane %v169_v20, 1 }
  0x9b   :  { %v171_v22 = vadd.f32 %v170_v21, %v169_v20 }
  0x9d   :  { %211 = vpush %v171_v22 }
  0xc6   :  { %s210_s25 = spop %209 }
  0xc7   :  { %162 = sst [smem:[#allocation9]] %s210_s25 }
  0xc8   :  { %183 = dma.smem_to_hbm %s305_s26, 16, %s181_s24, [#allocation6]  }
  0xce   :  { %s212_s30 = spop %211 }
  0xcf   :  { %174 = sst [smem:[#allocation10]] %s212_s30 }
  0xd0   :  { %192 = dma.smem_to_hbm %s306_s4, 16, %s190_s29, [#allocation11]  }
  0xd1   :  { %296 = dma.done.wait [#allocation6], 16  }
  0xd2   :  { %297 = vsyncadd [#allocation6], 4294967280 }
  0xd3   :  { %298 = dma.done.wait [#allocation11], 16  }
  0xd4   :  { %299 = vsyncadd [#allocation11], 4294967280 }
  0xd5   :  { %201 = sfence }
  0xd6   :  { %202 = vsyncpa [#allocation5], 1 }
  0xd7   :  { %203 = vsyncpa [#allocation8], 1 }
  0xd8   :  { %204 = vsyncpa [#allocation6], 1 }
  0xd9   :  { %205 = vsyncpa [#allocation11], 1 }

</bundles_post_ra>
